<compile_context>
chip_gen: v5e
topology: v5e:2x2
jax: 0.10.0
libtpu: 0.0.40
codegen_flags: <defaults>
</compile_context>

<pallas_src>
import jax
import jax.numpy as jnp
import numpy as np
from jax.experimental import pallas as pl
from jax.experimental.pallas import tpu as pltpu


def _pooler_kernel(x_ref, w_ref, o_ref):
    # x_ref: (TB, S, H), w_ref: (1, H), o_ref: (TB, H)
    x = x_ref[...].astype(jnp.float32)                 # (TB, S, H)
    w = w_ref[0].astype(jnp.float32)                   # (H,)

    # attention scores: broadcast multiply + lane reduce -> (TB, S)
    scores = jnp.sum(x * w, axis=-1)

    # numerically stable softmax over the sequence axis (axis=-1 of scores)
    m = jnp.max(scores, axis=-1, keepdims=True)        # (TB, 1)
    e = jnp.exp(scores - m)                            # (TB, S)
    denom = jnp.sum(e, axis=-1, keepdims=True)         # (TB, 1)

    # weighted sum over S (sublane reduce), normalization folded into one scale
    pooled = jnp.sum(x * e[:, :, None], axis=1)        # (TB, H)
    inv = pl.reciprocal(denom, approx=True)            # (TB, 1), EUP
    o_ref[...] = (pooled * inv).astype(o_ref.dtype)


def _choose_tb(B, S, H, itemsize, budget_bytes=24 << 20):
    """Largest divisor of B whose double-buffered (TB,S,H) slab fits the budget,
    preferring multiples of 8 for sublane-dense output stores."""
    bytes_per_row = 2 * S * H * itemsize               # double-buffered input
    max_tb = max(1, budget_bytes // max(1, bytes_per_row))
    divs = [d for d in range(1, B + 1) if B % d == 0 and d <= max_tb]
    if not divs:
        return 1
    mult8 = [d for d in divs if d % 8 == 0]
    return max(mult8) if mult8 else max(divs)


def feature_pooler(x, w, b=None):
    """x: (B, S, H), w: (H, 1), b: (1, 1) [ignored: softmax is shift-invariant
    to the scalar Linear(H->1) bias] -> (B, H)."""
    del b  # mathematically a no-op under the softmax
    B, S, H = x.shape
    w_row = jnp.reshape(w, (1, H)).astype(x.dtype)     # lane-dense weight

    tb = _choose_tb(B, S, H, x.dtype.itemsize)

    return pl.pallas_call(
        _pooler_kernel,
        out_shape=jax.ShapeDtypeStruct((B, H), x.dtype),
        grid=(B // tb,),
        in_specs=[
            pl.BlockSpec((tb, S, H), lambda bi: (bi, 0, 0)),
            pl.BlockSpec((1, H), lambda bi: (0, 0)),
        ],
        out_specs=pl.BlockSpec((tb, H), lambda bi: (bi, 0)),
        compiler_params=pltpu.CompilerParams(
            dimension_semantics=("parallel",),
            vmem_limit_bytes=48 << 20,                 # fits v7x's 64 MiB VMEM
        ),
    )(x, w_row)


def feature_pooler_ref(x, w, b):
    scores = jnp.einsum("bsh,ho->bso", x, w) + b[0, 0]  # (B, S, 1)
    attn = jax.nn.softmax(scores, axis=1)               # softmax over S
    return jnp.sum(x * attn, axis=1)                    # (B, H)


if __name__ == "__main__":
    B, S, H = 2, 8, 32

    key = jax.random.PRNGKey(0)
    kx, kw, kb = jax.random.split(key, 3)

    x = jax.random.normal(kx, (B, S, H), dtype=jnp.float32)

    # Deterministic nn.Linear(H, 1)-style init: U(-1/sqrt(H), 1/sqrt(H))
    bound = 1.0 / np.sqrt(H)
    w = jax.random.uniform(kw, (H, 1), dtype=jnp.float32, minval=-bound, maxval=bound)
    b = jax.random.uniform(kb, (1, 1), dtype=jnp.float32, minval=-bound, maxval=bound)

    out = feature_pooler(x, w, b)
    jax.block_until_ready(out)

    ref = feature_pooler_ref(x, w, b)
    # slightly relaxed tolerance for the EUP approx-reciprocal normalization
    np.testing.assert_allclose(np.asarray(out), np.asarray(ref), rtol=5e-3, atol=5e-3)

    print("KERNEL_OK")
</pallas_src>

<mosaic_0001>
module attributes {stable_mosaic.version = 11 : i64} {
  func.func @_pooler_kernel(%arg0: i32, %arg1: memref<2x8x32xf32, #tpu.memory_space<vmem>>, %arg2: memref<1x32xf32, #tpu.memory_space<vmem>>, %arg3: memref<2x32xf32, #tpu.memory_space<vmem>>) attributes {dimension_semantics = [#tpu.dimension_semantics<parallel>], iteration_bounds = array<i64: 1>, scalar_prefetch = 0 : i64, scratch_operands = 0 : i64, tpu.core_type = #tpu.core_type<tc>, window_params = [{transform_indices = @transform_0, window_bounds = array<i64: 2, 8, 32>}, {pipeline_mode = #tpu.pipeline_mode<synchronous>, transform_indices = @transform_1, window_bounds = array<i64: 1, 32>}, {transform_indices = @transform_2, window_bounds = array<i64: 2, 32>}]} {
    %c0 = arith.constant 0 : index
    %c0_0 = arith.constant 0 : index
    %c0_1 = arith.constant 0 : index
    %0 = vector.load %arg1[%c0, %c0_0, %c0_1] : memref<2x8x32xf32, #tpu.memory_space<vmem>>, vector<2x8x32xf32>
    %c0_2 = arith.constant 0 : index
    %c0_3 = arith.constant 0 : index
    %1 = vector.load %arg2[%c0_2, %c0_3] : memref<1x32xf32, #tpu.memory_space<vmem>>, vector<1x32xf32>
    %2 = vector.shape_cast %1 : vector<1x32xf32> to vector<32xf32>
    %3 = vector.shape_cast %2 : vector<32xf32> to vector<1x1x32xf32>
    %4 = vector.broadcast %3 : vector<1x1x32xf32> to vector<2x8x32xf32>
    %5 = arith.mulf %0, %4 : vector<2x8x32xf32>
    %cst = arith.constant dense<0.000000e+00> : vector<2x8xf32>
    %6 = vector.multi_reduction <add>, %5, %cst [2] : vector<2x8x32xf32> to vector<2x8xf32>
    %cst_4 = arith.constant dense<0xFF800000> : vector<2xf32>
    %7 = vector.multi_reduction <maximumf>, %6, %cst_4 [1] : vector<2x8xf32> to vector<2xf32>
    %8 = vector.shape_cast %7 : vector<2xf32> to vector<2x1xf32>
    %9 = vector.broadcast %8 : vector<2x1xf32> to vector<2x8xf32>
    %10 = arith.subf %6, %9 : vector<2x8xf32>
    %11 = math.exp %10 : vector<2x8xf32>
    %cst_5 = arith.constant dense<0.000000e+00> : vector<2xf32>
    %12 = vector.multi_reduction <add>, %11, %cst_5 [1] : vector<2x8xf32> to vector<2xf32>
    %13 = vector.shape_cast %12 : vector<2xf32> to vector<2x1xf32>
    %14 = vector.shape_cast %11 : vector<2x8xf32> to vector<2x8x1xf32>
    %15 = vector.broadcast %14 : vector<2x8x1xf32> to vector<2x8x32xf32>
    %16 = arith.mulf %0, %15 : vector<2x8x32xf32>
    %cst_6 = arith.constant dense<0.000000e+00> : vector<2x32xf32>
    %17 = vector.multi_reduction <add>, %16, %cst_6 [1] : vector<2x8x32xf32> to vector<2x32xf32>
    %18 = tpu.reciprocal %13 {approx = true} : vector<2x1xf32> -> vector<2x1xf32>
    %19 = vector.broadcast %18 : vector<2x1xf32> to vector<2x32xf32>
    %20 = arith.mulf %17, %19 : vector<2x32xf32>
    %c0_7 = arith.constant 0 : index
    %c0_8 = arith.constant 0 : index
    %21 = vector.load %arg3[%c0_7, %c0_8] : memref<2x32xf32, #tpu.memory_space<vmem>>, vector<2x32xf32>
    tpu.vector_store %arg3[%c0_7, %c0_8], %20 {strides = array<i32>} : memref<2x32xf32, #tpu.memory_space<vmem>>, vector<2x32xf32>,
    return
  }
  func.func @transform_0(%arg0: i32) -> (i32, i32, i32) {
    %c0_i32 = arith.constant 0 : i32
    %c0_i32_0 = arith.constant 0 : i32
    %c0_i32_1 = arith.constant 0 : i32
    return %arg0, %c0_i32, %c0_i32_0 : i32, i32, i32
  }
  func.func @transform_1(%arg0: i32) -> (i32, i32) {
    %c0_i32 = arith.constant 0 : i32
    %c0_i32_0 = arith.constant 0 : i32
    %c0_i32_1 = arith.constant 0 : i32
    return %c0_i32, %c0_i32_0 : i32, i32
  }
  func.func @transform_2(%arg0: i32) -> (i32, i32) {
    %c0_i32 = arith.constant 0 : i32
    %c0_i32_0 = arith.constant 0 : i32
    return %arg0, %c0_i32 : i32, i32
  }
}

</mosaic_0001>

<bundles_post_ra>
// kernel: tpu_custom_call.1
= control target key start
LH: loop header
LB: loop body
LE: loop exit
PB: predicated region body
PF: predicated region fallthrough
CT: control target
= control target key end

     0   :  { %7 = vsyncpa [#allocation3], 0  ;;  %s279_s0 = inlined_call_operand.hbm [shape: f32[2,8,32], index: 0, kind: input, shape index: {}]   ;;  %s280_s1 = inlined_call_operand.hbm [shape: f32[1,32], index: 1, kind: input, shape index: {}]   ;;  %s281_s2 = inlined_call_operand.hbm [shape: f32[2,32], index: 2, kind: output, shape index: {}]  }
   0x1   :  { %8 = vsyncpa [#allocation6], 0 }
   0x2   :  { %9 = vsyncpa [#allocation4], 0  ;;  %s14_s11 = sshll.u32 %s279_s0, 4  ;;  %s240_s12 = smov [#allocation2]   ;;  %s15_s11 = int_to_ptr.hbm [resolvable:$true] %s14_s11 }
   0x3   :  { %s16_s13 = sshll.u32 %s240_s12, 4  ;;  %s28_s16 = sshll.u32 %s280_s1, 4  ;;  %s17_s13 = int_to_ptr.vmem [resolvable:$true] %s16_s13  ;;  %s29_s16 = int_to_ptr.hbm [resolvable:$true] %s28_s16 }
   0x4   :  { %s241_s17 = smov 128   ;;  %s242_s18 = smov 8  }
   0x5   :  { %22 = dma.hbm_to_vmem [thread:$0]  %s15_s11, 256, %s17_s13, [#allocation3], %s241_s17, %s241_s17, %s242_s18  }
   0x6   :  { %s243_s19 = smov [#allocation5]  }
   0x7   :  { %s30_s20 = sshll.u32 %s243_s19, 4  ;;  %s31_s20 = int_to_ptr.vmem [resolvable:$true] %s30_s20 }
   0x8   :  { %33 = dma.hbm_to_vmem [thread:$0]  %s29_s16, 16, %s31_s20, [#allocation6]  }
   0x9   :  { %234 = dma.done.wait [#allocation3], 256  }
   0xa   :  { %235 = vsyncadd [#allocation3], 4294967040 }
   0xb   :  { %236 = dma.done.wait [#allocation6], 16  }
   0xc   :  { %237 = vsyncadd [#allocation6], 4294967280  ;;  %v42_v0 = vld [vmem:[#allocation2] sm:$0xff]  ;;  %v155_v1 = vld [vmem:[#allocation5] ss:$0 sm:$0xff]  ;;  %vm50_vm0 = vcmask 261120   ;;  %v59_v8 = vlaneseq }
   0xd   :  { %v48_v2 = vmul.f32 %v155_v1, %v42_v0  ;;  %v43_v3 = vld [vmem:[#allocation2 + $0x8] sm:$0xff]  ;;  %vm63_vm1 = vcmask 1041409   ;;  %vm66_vm2 = vcmask 58368   ;;  %v244_v15 = vmov 0   ;;  %s245_s0 = smov [#allocation7]   ;;  %s135_s23 = sshll.u32 %s281_s2, 4  ;;  %s136_s23 = int_to_ptr.hbm [resolvable:$true] %s135_s23 }
   0xe   :  { %v49_v5 = vmul.f32 %v155_v1, %v43_v3  ;;  %v60_v9 = vand.u32 127, %v59_v8  ;;  %153 = vset.pattern.permute.xlu2 %v244_v15  ;;  %152 = vset.pattern.permute.xlu1 %v244_v15  ;;  %s133_s1 = sshll.u32 %s245_s0, 4  ;;  %vm126_vm3 = vcmask 254976   ;;  %s134_s1 = int_to_ptr.vmem [resolvable:$true] %s133_s1 }
   0xf   :  { %v51_v4 = vsel %vm50_vm0, %v48_v2, 0.0  ;;  %154 = vset.pattern.permute.xlu0 %v244_v15 }
  0x10   :  { %52 = vadd.xlane.f32.xlu0 %v51_v4  ;;  %v54_v6 = vsel %vm50_vm0, %v49_v5, 0.0 }
  0x18   :  { %55 = vadd.xlane.f32.xlu0 %v54_v6 }
  0x83   :  { %v53_v7 = vpop.xlane.xlu0 %52 }
  0x84   :  { %v61_v11 = vperm.slane %v53_v7, %v60_v9 }
  0x8b   :  { %v56_v10 = vpop.xlane.xlu0 %55 }
  0x8c   :  { %v62_v12 = vperm.slane %v56_v10, %v60_v9 }
  0x8e   :  { %v64_v13 = vsel %vm63_vm1, %v62_v12, %v61_v11 }
  0x8f   :  { %v67_v14 = vsel %vm66_vm2, %v64_v13, -inf }
  0x90   :  { %68 = vmax.xlane.f32.xlu1 %v67_v14 }
 0x103   :  { %v69_v16 = vpop.xlane.xlu1 %68 }
 0x104   :  { %v71_v17 = vperm.slane %v69_v16, 0  ;;  %v72_v18 = vperm.slane %v69_v16, 1 }
 0x106   :  { %v75_v19 = vsub.f32 %v53_v7, %v71_v17  ;;  %v76_v20 = vsub.f32 %v56_v10, %v72_v18 }
 0x108   :  { %v77_v21 = vmul.f32 1.442695, %v75_v19  ;;  %v79_v22 = vmul.f32 1.442695, %v76_v20 }
 0x10a   :  { %156 = vpow2.f32 %v77_v21 }
 0x10b   :  { %158 = vpow2.f32 %v79_v22 }
 0x110   :  { %v157_v23 = vpop.eup %156 }
 0x111   :  { %v159_v24 = vpop.eup %158  ;;  %84 = vperm.xlu1 %152, %v157_v23  }
 0x112   :  { %87 = vperm.xlu2 %153, %v159_v24  }
 0x16c   :  { %v88_v25 = vpop.permute.xlu2 %87 }
 0x16d   :  { %v90_v27 = vperm.slane %v88_v25, %v60_v9  ;;  %v99_v31 = vmul.f32 %v88_v25, %v43_v3 }
 0x16f   :  { %v107_v33 = vsel %vm50_vm0, %v99_v31, 0.0 }
 0x170   :  { %v108_v35 = vrot.slane %v107_v33, 4 }
 0x172   :  { %v109_v37 = vadd.f32 %v108_v35, %v107_v33 }
 0x174   :  { %v110_v39 = vrot.slane %v109_v37, 2 }
 0x176   :  { %v111_v41 = vadd.f32 %v110_v39, %v109_v37 }
 0x178   :  { %v112_v44 = vrot.slane %v111_v41, 1 }
 0x17a   :  { %v113_v47 = vadd.f32 %v112_v44, %v111_v41 }
 0x183   :  { %v85_v26 = vpop.permute.xlu1 %84 }
 0x184   :  { %v89_v28 = vperm.slane %v85_v26, %v60_v9  ;;  %v98_v32 = vmul.f32 %v85_v26, %v42_v0 }
 0x186   :  { %v91_v29 = vsel %vm63_vm1, %v90_v27, %v89_v28  ;;  %v100_v34 = vsel %vm50_vm0, %v98_v32, 0.0 }
 0x187   :  { %v93_v30 = vsel %vm66_vm2, %v91_v29, 0.0  ;;  %v101_v36 = vrot.slane %v100_v34, 4 }
 0x188   :  { %94 = vadd.xlane.f32.xlu2 %v93_v30 }
 0x189   :  { %v102_v38 = vadd.f32 %v101_v36, %v100_v34 }
 0x18b   :  { %v103_v40 = vrot.slane %v102_v38, 2 }
 0x18d   :  { %v104_v43 = vadd.f32 %v103_v40, %v102_v38 }
 0x18f   :  { %v105_v45 = vrot.slane %v104_v43, 1 }
 0x191   :  { %v106_v49 = vadd.f32 %v105_v45, %v104_v43 }
 0x1fb   :  { %v95_v42 = vpop.xlane.xlu2 %94 }
 0x1fc   :  { %160 = vrcp.f32 %v95_v42 }
 0x202   :  { %v161_v46 = vpop.eup %160 }
 0x203   :  { %v116_v48 = vrot.slane %v161_v46, 1  ;;  %v119_v51 = vmul.f32 %v161_v46, %v106_v49 }
 0x205   :  { %v120_v50 = vmul.f32 %v116_v48, %v113_v47 }
 0x207   :  { %v123_v52 = vrot.slane %v120_v50, 7 }
 0x209   :  { %v124_v53 = vsel %vm63_vm1, %v123_v52, %v119_v51 }
 0x20a   :  { %127 = vst.msk [vmem:[#allocation7] sm:$0x3] %vm126_vm3, %v124_v53 }
 0x20b   :  { %138 = dma.vmem_to_hbm [thread:$0]  %s134_s1, 32, %s136_s23, [#allocation4]  }
 0x20c   :  { %238 = dma.done.wait [#allocation4], 32  }
 0x20d   :  { %239 = vsyncadd [#allocation4], 4294967264 }
 0x20e   :  { %143 = vsyncpa [#allocation3], 1 }
 0x20f   :  { %144 = vsyncpa [#allocation6], 1 }
 0x210   :  { %145 = vsyncpa [#allocation4], 1 }

</bundles_post_ra>
